<compile_context>
chip_gen: v7x
topology: tpu7x:2x2x1
jax: 0.10.0
libtpu: 0.0.40
codegen_flags: <defaults>
</compile_context>

<pallas_src>
import jax
import jax.numpy as jnp
from jax.experimental import pallas as pl
from jax.experimental.pallas import tpu as pltpu


R = 64  # batch rows packed per lane-dense "super-row"


def _affine_kernel(x_ref, w_ref, b_ref, o_ref):
    # x_ref: (tile_rows, R*10) f32 — batch-tiled, double-buffered by Pallas
    # w_ref: (R*10, R*5)       f32 — block-diagonal folded weight, VMEM-resident
    # b_ref: (1, R*5)          f32 — tiled folded bias, VMEM-resident
    # o_ref: (tile_rows, R*5)  f32
    acc = jnp.dot(x_ref[...], w_ref[...], preferred_element_type=jnp.float32)
    o_ref[...] = (acc + b_ref[...]).astype(o_ref.dtype)


def net_forward(x, w1, b1, w2, b2, *, max_tile_rows=2048):
    """_Net forward. x:(B,10), w1:(10,30), b1:(1,30), w2:(30,5), b2:(1,5) -> (B,5)."""
    B, K = x.shape            # K = 10
    N = w2.shape[1]           # N = 5
    f32 = jnp.float32

    # --- Exact algebraic fold of the two Linear layers. ---
    wc = w1.astype(f32) @ w2.astype(f32)                      # (10, 5)
    bc = b1.astype(f32) @ w2.astype(f32) + b2.astype(f32)     # (1, 5)

    # --- Lane-dense repack: 64 batch rows per super-row. ---
    wcb = jnp.kron(jnp.eye(R, dtype=f32), wc)                 # (R*K, R*N) = (640, 320)
    bcb = jnp.tile(bc, (1, R))                                 # (1, R*N)   = (1, 320)

    Bp = pl.cdiv(B, R) * R
    x_f = x.astype(f32)
    x_p = jnp.pad(x_f, ((0, Bp - B), (0, 0))) if Bp != B else x_f
    S = Bp // R
    xs = x_p.reshape(S, R * K)                                 # (S, 640) contiguous view

    # --- Batch-tile selection (in super-rows). ---
    if S <= 16:
        tile_rows = S                      # block == full extent: always legal
    else:
        # >= 2 grid steps so the "parallel" axis can use both v7x TensorCores;
        # multiple of 8 for f32 sublane tiling; capped so double-buffered
        # (input + output) blocks stay ~17 MiB << 64 MiB v7x VMEM.
        tile_rows = min(max_tile_rows, ((pl.cdiv(S, 2) + 7) // 8) * 8)
    grid = (pl.cdiv(S, tile_rows),)

    out = pl.pallas_call(
        _affine_kernel,
        out_shape=jax.ShapeDtypeStruct((S, R * N), f32),
        grid=grid,
        in_specs=[
            pl.BlockSpec((tile_rows, R * K), lambda i: (i, 0)),   # x: tiled + pipelined
            pl.BlockSpec((R * K, R * N), lambda i: (0, 0)),       # Wcb: VMEM-resident
            pl.BlockSpec((1, R * N), lambda i: (0, 0)),           # bcb: VMEM-resident
        ],
        out_specs=pl.BlockSpec((tile_rows, R * N), lambda i: (i, 0)),
        compiler_params=pltpu.CompilerParams(
            dimension_semantics=("parallel",),       # megacore sharding on v7x
            vmem_limit_bytes=48 * 1024 * 1024,       # headroom if max_tile_rows raised
        ),
    )(xs, wcb, bcb)

    # Undo the super-row view and drop the zero-padded batch rows.
    return out.reshape(Bp, N)[:B].astype(x.dtype)


def init_params(key):
    """torch.nn.Linear-style init U(-1/sqrt(fan_in), 1/sqrt(fan_in)).

    Weights stored pre-transposed as (in_features, out_features)."""
    k1, k2, k3, k4 = jax.random.split(key, 4)
    in1, out1 = 10, 30
    in2, out2 = 30, 5
    bound1 = 1.0 / jnp.sqrt(in1)
    bound2 = 1.0 / jnp.sqrt(in2)
    w1 = jax.random.uniform(k1, (in1, out1), jnp.float32, -bound1, bound1)
    b1 = jax.random.uniform(k2, (1, out1), jnp.float32, -bound1, bound1)
    w2 = jax.random.uniform(k3, (in2, out2), jnp.float32, -bound2, bound2)
    b2 = jax.random.uniform(k4, (1, out2), jnp.float32, -bound2, bound2)
    return w1, b1, w2, b2


if __name__ == "__main__":
    key = jax.random.PRNGKey(0)
    kx, kp = jax.random.split(key)
    w1, b1, w2, b2 = init_params(kp)

    def ref_fwd(xv):
        return (xv @ w1 + b1) @ w2 + b2

    # Primary small-shape test (B=2): single grid step, block == full extent.
    B = 2
    x = jax.random.normal(kx, (B, 10), dtype=jnp.float32)
    out = net_forward(x, w1, b1, w2, b2)
    jax.block_until_ready(out)
    assert out.shape == (B, 5)
    # Tolerance covers XLA/MXU default f32 matmul precision and the (exact) fold's
    # re-association; structural bugs would show up as O(1) errors.
    assert jnp.allclose(out, ref_fwd(x), atol=2e-2, rtol=2e-2), (out, ref_fwd(x))

    # Non-divisible batch / multi-step-grid test: B=1300 -> 21 super-rows, grid of 2,
    # partial last block, zero-padded rows sliced off.
    B2 = 1300
    x2 = jax.random.normal(jax.random.PRNGKey(1), (B2, 10), dtype=jnp.float32)
    out2 = net_forward(x2, w1, b1, w2, b2)
    jax.block_until_ready(out2)
    assert out2.shape == (B2, 5)
    assert jnp.allclose(out2, ref_fwd(x2), atol=2e-2, rtol=2e-2)

    print("KERNEL_OK")
</pallas_src>

<mosaic_0001>
module attributes {stable_mosaic.version = 11 : i64} {
  func.func @_affine_kernel(%arg0: i32, %arg1: memref<1x640xf32, #tpu.memory_space<vmem>>, %arg2: memref<640x320xf32, #tpu.memory_space<vmem>>, %arg3: memref<1x320xf32, #tpu.memory_space<vmem>>, %arg4: memref<1x320xf32, #tpu.memory_space<vmem>>) attributes {dimension_semantics = [#tpu.dimension_semantics<parallel>], iteration_bounds = array<i64: 1>, scalar_prefetch = 0 : i64, scratch_operands = 0 : i64, tpu.core_type = #tpu.core_type<tc>, window_params = [{transform_indices = @transform_0, window_bounds = array<i64: 1, 640>}, {pipeline_mode = #tpu.pipeline_mode<synchronous>, transform_indices = @transform_1, window_bounds = array<i64: 640, 320>}, {pipeline_mode = #tpu.pipeline_mode<synchronous>, transform_indices = @transform_2, window_bounds = array<i64: 1, 320>}, {transform_indices = @transform_3, window_bounds = array<i64: 1, 320>}]} {
    %c0 = arith.constant 0 : index
    %c0_0 = arith.constant 0 : index
    %0 = vector.load %arg1[%c0, %c0_0] : memref<1x640xf32, #tpu.memory_space<vmem>>, vector<1x640xf32>
    %c0_1 = arith.constant 0 : index
    %c0_2 = arith.constant 0 : index
    %1 = vector.load %arg2[%c0_1, %c0_2] : memref<640x320xf32, #tpu.memory_space<vmem>>, vector<640x320xf32>
    %cst = arith.constant dense<0.000000e+00> : vector<1x320xf32>
    %2 = tpu.matmul %0, %1, %cst {dimension_numbers = #tpu.dot_dimension_numbers<[1], [0], [0], [1], [0, 0, 1, 1], [], []>} : vector<1x640xf32>, vector<640x320xf32>, vector<1x320xf32> -> vector<1x320xf32>
    %c0_3 = arith.constant 0 : index
    %c0_4 = arith.constant 0 : index
    %3 = vector.load %arg3[%c0_3, %c0_4] : memref<1x320xf32, #tpu.memory_space<vmem>>, vector<1x320xf32>
    %4 = arith.addf %2, %3 : vector<1x320xf32>
    %c0_5 = arith.constant 0 : index
    %c0_6 = arith.constant 0 : index
    %5 = vector.load %arg4[%c0_5, %c0_6] : memref<1x320xf32, #tpu.memory_space<vmem>>, vector<1x320xf32>
    tpu.vector_store %arg4[%c0_5, %c0_6], %4 {strides = array<i32>} : memref<1x320xf32, #tpu.memory_space<vmem>>, vector<1x320xf32>,
    return
  }
  func.func @transform_0(%arg0: i32) -> (i32, i32) {
    %c0_i32 = arith.constant 0 : i32
    %c0_i32_0 = arith.constant 0 : i32
    return %arg0, %c0_i32 : i32, i32
  }
  func.func @transform_1(%arg0: i32) -> (i32, i32) {
    %c0_i32 = arith.constant 0 : i32
    %c0_i32_0 = arith.constant 0 : i32
    %c0_i32_1 = arith.constant 0 : i32
    return %c0_i32, %c0_i32_0 : i32, i32
  }
  func.func @transform_2(%arg0: i32) -> (i32, i32) {
    %c0_i32 = arith.constant 0 : i32
    %c0_i32_0 = arith.constant 0 : i32
    %c0_i32_1 = arith.constant 0 : i32
    return %c0_i32, %c0_i32_0 : i32, i32
  }
  func.func @transform_3(%arg0: i32) -> (i32, i32) {
    %c0_i32 = arith.constant 0 : i32
    %c0_i32_0 = arith.constant 0 : i32
    return %arg0, %c0_i32 : i32, i32
  }
}

</mosaic_0001>

<bundles_post_ra>
// kernel: tpu_custom_call.1
= control target key start
LH: loop header
LB: loop body
LE: loop exit
PB: predicated region body
PF: predicated region fallthrough
CT: control target
= control target key end

     0   :  { %v1173_v7 = vmov 0.0   ;;  %v258_v61 = vlaneseq  ;;  %s1987_s0 = inlined_call_operand.vmem [shape: f32[1,640], index: 0, kind: input, shape index: {}]   ;;  %s1988_s1 = inlined_call_operand.vmem [shape: f32[640,320], index: 1, kind: input, shape index: {}]   ;;  %s1989_s2 = inlined_call_operand.vmem [shape: f32[1,320], index: 2, kind: input, shape index: {}]   ;;  %s1990_s3 = inlined_call_operand.hbm [shape: f32[1,320], index: 3, kind: output, shape index: {}]  }
   0x1   :  { %v17_v0 = vld [vmem:[%s1988_s1 + $0x8] sm:$0xff]  ;;  %v20_v1 = vld [vmem:[%s1988_s1 + $0x20] sm:$0xff]  ;;  %v19_v6 = vld [vmem:[%s1988_s1 + $0x18] sm:$0xff]  ;;  %505 = vmatprep.mubr.f32.mxu1 %v1173_v7 }
   0x2   :  { %v209_v2 = vld [vmem:[%s1988_s1 + $0x608] sm:$0xff]  ;;  %v890_v3 = vpack.c.bf16 %v20_v1, %v17_v0  ;;  %v212_v4 = vld [vmem:[%s1988_s1 + $0x620] sm:$0xff]  ;;  %v211_v11 = vld [vmem:[%s1988_s1 + $0x618] sm:$0xff] }
   0x3   :  { %v16_v5 = vld [vmem:[%s1988_s1] sm:$0xff]  ;;  %v1018_v8 = vpack.c.bf16 %v212_v4, %v209_v2  ;;  %v23_v12 = vld [vmem:[%s1988_s1 + $0x38] sm:$0xff]  ;;  %v26_v14 = vld [vmem:[%s1988_s1 + $0x50] sm:$0xff] }
   0x4   :  { %v892_v9 = vpack.c.bf16 %v19_v6, %v16_v5  ;;  %v208_v10 = vld [vmem:[%s1988_s1 + $0x600] sm:$0xff]  ;;  %891 = vmatprep.subr.bf16.mxu0 %v890_v3  ;;  %v215_v15 = vld [vmem:[%s1988_s1 + $0x638] sm:$0xff]  ;;  %v218_v16 = vld [vmem:[%s1988_s1 + $0x650] sm:$0xff]  ;;  %v894_v17 = vpack.c.bf16 %v26_v14, %v23_v12 }
   0x5   :  { %v1020_v13 = vpack.c.bf16 %v211_v11, %v208_v10  ;;  %1019 = vmatprep.subr.bf16.mxu1 %v1018_v8  ;;  %v1022_v18 = vpack.c.bf16 %v218_v16, %v215_v15  ;;  %v22_v19 = vld [vmem:[%s1988_s1 + $0x30] sm:$0xff]  ;;  %v25_v20 = vld [vmem:[%s1988_s1 + $0x48] sm:$0xff]  ;;  %v32_v25 = vld [vmem:[%s1988_s1 + $0x80] sm:$0xff]  ;;  %v1350_v11 = vshrl.u32 %v258_v61, 7 }
   0x6   :  { %893 = vmatpush1.bf16.msra.mxu0 %v892_v9  ;;  %v214_v21 = vld [vmem:[%s1988_s1 + $0x630] sm:$0xff]  ;;  %v896_v22 = vpack.c.bf16 %v25_v20, %v22_v19  ;;  %v217_v23 = vld [vmem:[%s1988_s1 + $0x648] sm:$0xff]  ;;  %v224_v29 = vld [vmem:[%s1988_s1 + $0x680] sm:$0xff] }
   0x7   :  { %1021 = vmatpush1.bf16.msra.mxu1 %v1020_v13  ;;  %v29_v24 = vld [vmem:[%s1988_s1 + $0x68] sm:$0xff]  ;;  %895 = vmatprep.subr.bf16.mxu0 %v894_v17  ;;  %v1024_v26 = vpack.c.bf16 %v217_v23, %v214_v21  ;;  %v28_v30 = vld [vmem:[%s1988_s1 + $0x60] sm:$0xff]  ;;  %v31_v32 = vld [vmem:[%s1988_s1 + $0x78] sm:$0xff]  ;;  %v264_v15 = vsub.s32 1, %v1350_v11 }
   0x8   :  { %1023 = vmatprep.subr.bf16.mxu1 %v1022_v18  ;;  %v898_v27 = vpack.c.bf16 %v32_v25, %v29_v24  ;;  %v221_v28 = vld [vmem:[%s1988_s1 + $0x668] sm:$0xff]  ;;  %v220_v33 = vld [vmem:[%s1988_s1 + $0x660] sm:$0xff]  ;;  %v223_v34 = vld [vmem:[%s1988_s1 + $0x678] sm:$0xff]  ;;  %v900_v35 = vpack.c.bf16 %v31_v32, %v28_v30 }
   0x9   :  { %v1026_v31 = vpack.c.bf16 %v224_v29, %v221_v28  ;;  %v35_v36 = vld [vmem:[%s1988_s1 + $0x98] sm:$0xff]  ;;  %v38_v37 = vld [vmem:[%s1988_s1 + $0xb0] sm:$0xff]  ;;  %v1028_v39 = vpack.c.bf16 %v223_v34, %v220_v33  ;;  %v37_v43 = vld [vmem:[%s1988_s1 + $0xa8] sm:$0xff] }
   0xa   :  { %897 = vmatpush1.bf16.msra.mxu0 %v896_v22  ;;  %v227_v38 = vld [vmem:[%s1988_s1 + $0x698] sm:$0xff]  ;;  %v902_v40 = vpack.c.bf16 %v38_v37, %v35_v36  ;;  %v230_v41 = vld [vmem:[%s1988_s1 + $0x6b0] sm:$0xff]  ;;  %v229_v46 = vld [vmem:[%s1988_s1 + $0x6a8] sm:$0xff] }
   0xb   :  { %1025 = vmatpush1.bf16.msra.mxu1 %v1024_v26  ;;  %899 = vmatprep.subr.bf16.mxu0 %v898_v27  ;;  %v34_v42 = vld [vmem:[%s1988_s1 + $0x90] sm:$0xff]  ;;  %v1030_v44 = vpack.c.bf16 %v230_v41, %v227_v38  ;;  %v41_v47 = vld [vmem:[%s1988_s1 + $0xc8] sm:$0xff]  ;;  %v44_v48 = vld [vmem:[%s1988_s1 + $0xe0] sm:$0xff] }
   0xc   :  { %1027 = vmatprep.subr.bf16.mxu1 %v1026_v31  ;;  %v226_v45 = vld [vmem:[%s1988_s1 + $0x690] sm:$0xff]  ;;  %v233_v49 = vld [vmem:[%s1988_s1 + $0x6c8] sm:$0xff]  ;;  %v236_v50 = vld [vmem:[%s1988_s1 + $0x6e0] sm:$0xff]  ;;  %v904_v51 = vpack.c.bf16 %v37_v43, %v34_v42  ;;  %v906_v53 = vpack.c.bf16 %v44_v48, %v41_v47  ;;  %v276_v42 = vsub.s32 4, %v1350_v11 }
   0xd   :  { %v1032_v52 = vpack.c.bf16 %v229_v46, %v226_v45  ;;  %v40_v54 = vld [vmem:[%s1988_s1 + $0xc0] sm:$0xff]  ;;  %v43_v55 = vld [vmem:[%s1988_s1 + $0xd8] sm:$0xff]  ;;  %v1034_v57 = vpack.c.bf16 %v236_v50, %v233_v49  ;;  %v50_v60 = vld [vmem:[%s1988_s1 + $0x110] sm:$0xff] }
   0xe   :  { %901 = vmatpush1.bf16.msra.mxu0 %v900_v35  ;;  %v232_v56 = vld [vmem:[%s1988_s1 + $0x6c0] sm:$0xff]  ;;  %v235_v58 = vld [vmem:[%s1988_s1 + $0x6d8] sm:$0xff]  ;;  %v242_v63 = vld [vmem:[%s1988_s1 + $0x710] sm:$0xff]  ;;  %v908_v0 = vpack.c.bf16 %v43_v55, %v40_v54 }
   0xf   :  { %1029 = vmatpush1.bf16.msra.mxu1 %v1028_v39  ;;  %903 = vmatprep.subr.bf16.mxu0 %v902_v40  ;;  %v47_v59 = vld [vmem:[%s1988_s1 + $0xf8] sm:$0xff]  ;;  %v1036_v1 = vpack.c.bf16 %v235_v58, %v232_v56  ;;  %v46_v3 = vld [vmem:[%s1988_s1 + $0xf0] sm:$0xff]  ;;  %v49_v4 = vld [vmem:[%s1988_s1 + $0x108] sm:$0xff] }
  0x10   :  { %1031 = vmatprep.subr.bf16.mxu1 %v1030_v44  ;;  %v239_v62 = vld [vmem:[%s1988_s1 + $0x6f8] sm:$0xff]  ;;  %v910_v2 = vpack.c.bf16 %v50_v60, %v47_v59  ;;  %v238_v5 = vld [vmem:[%s1988_s1 + $0x6f0] sm:$0xff]  ;;  %v241_v8 = vld [vmem:[%s1988_s1 + $0x708] sm:$0xff]  ;;  %v912_v14 = vpack.c.bf16 %v49_v4, %v46_v3 }
  0x11   :  { %v1038_v6 = vpack.c.bf16 %v242_v63, %v239_v62  ;;  %v53_v9 = vld [vmem:[%s1988_s1 + $0x128] sm:$0xff]  ;;  %v56_v10 = vld [vmem:[%s1988_s1 + $0x140] sm:$0xff]  ;;  %v1040_v16 = vpack.c.bf16 %v241_v8, %v238_v5  ;;  %v55_v19 = vld [vmem:[%s1988_s1 + $0x138] sm:$0xff] }
  0x12   :  { %905 = vmatpush1.bf16.msra.mxu0 %v904_v51  ;;  %v245_v12 = vld [vmem:[%s1988_s1 + $0x728] sm:$0xff]  ;;  %v248_v13 = vld [vmem:[%s1988_s1 + $0x740] sm:$0xff]  ;;  %v914_v17 = vpack.c.bf16 %v56_v10, %v53_v9  ;;  %v247_v22 = vld [vmem:[%s1988_s1 + $0x738] sm:$0xff] }
  0x13   :  { %1033 = vmatpush1.bf16.msra.mxu1 %v1032_v52  ;;  %907 = vmatprep.subr.bf16.mxu0 %v906_v53  ;;  %v52_v18 = vld [vmem:[%s1988_s1 + $0x120] sm:$0xff]  ;;  %v1042_v21 = vpack.c.bf16 %v248_v13, %v245_v12  ;;  %v59_v23 = vld [vmem:[%s1988_s1 + $0x158] sm:$0xff]  ;;  %v62_v24 = vld [vmem:[%s1988_s1 + $0x170] sm:$0xff] }
  0x14   :  { %1035 = vmatprep.subr.bf16.mxu1 %v1034_v57  ;;  %v244_v20 = vld [vmem:[%s1988_s1 + $0x720] sm:$0xff]  ;;  %v251_v25 = vld [vmem:[%s1988_s1 + $0x758] sm:$0xff]  ;;  %v254_v26 = vld [vmem:[%s1988_s1 + $0x770] sm:$0xff]  ;;  %v916_v28 = vpack.c.bf16 %v55_v19, %v52_v18  ;;  %v918_v31 = vpack.c.bf16 %v62_v24, %v59_v23 }
  0x15   :  { %v1386_v27 = vld [vmem:[%s1987_s0] sm:$0x1f]  ;;  %v1044_v30 = vpack.c.bf16 %v247_v22, %v244_v20  ;;  %v58_v32 = vld [vmem:[%s1988_s1 + $0x150] sm:$0xff]  ;;  %v61_v33 = vld [vmem:[%s1988_s1 + $0x168] sm:$0xff]  ;;  %v1046_v35 = vpack.c.bf16 %v254_v26, %v251_v25 }
  0x16   :  { %909 = vmatpush1.bf16.msra.mxu0 %v908_v0  ;;  %v1391_v29 = vrot.slane %v1386_v27, %v264_v15  ;;  %v250_v34 = vld [vmem:[%s1988_s1 + $0x750] sm:$0xff]  ;;  %v253_v36 = vld [vmem:[%s1988_s1 + $0x768] sm:$0xff]  ;;  %v68_v38 = vld [vmem:[%s1988_s1 + $0x1a0] sm:$0xff]  ;;  %v920_v41 = vpack.c.bf16 %v61_v33, %v58_v32  ;;  %v1444_v55 = vrot.slane %v1386_v27, %v276_v42 }
  0x17   :  { %1037 = vmatpush1.bf16.msra.mxu1 %v1036_v1  ;;  %911 = vmatprep.subr.bf16.mxu0 %v910_v2  ;;  %v65_v37 = vld [vmem:[%s1988_s1 + $0x188] sm:$0xff]  ;;  %v66_v39 = vld [vmem:[%s1988_s1 + $0x190] sm:$0xff]  ;;  %v1048_v43 = vpack.c.bf16 %v253_v36, %v250_v34  ;;  %v64_v45 = vld [vmem:[%s1988_s1 + $0x180] sm:$0xff] }
  0x18   :  { %1039 = vmatprep.subr.bf16.mxu1 %v1038_v6  ;;  %363 = vmatprep.mubr.f32.mxu0 %v1391_v29  ;;  %v69_v40 = vld [vmem:[%s1988_s1 + $0x1a8] sm:$0xff]  ;;  %v922_v44 = vpack.c.bf16 %v68_v38, %v65_v37  ;;  %v67_v46 = vld [vmem:[%s1988_s1 + $0x198] sm:$0xff]  ;;  %v18_v47 = vld [vmem:[%s1988_s1 + $0x10] sm:$0xff] }
  0x19   :  { %v1050_v48 = vpack.c.bf16 %v69_v40, %v66_v39  ;;  %v21_v49 = vld [vmem:[%s1988_s1 + $0x28] sm:$0xff]  ;;  %v71_v50 = vld [vmem:[%s1988_s1 + $0x1b8] sm:$0xff]  ;;  %v74_v51 = vld [vmem:[%s1988_s1 + $0x1d0] sm:$0xff]  ;;  %v924_v54 = vpack.c.bf16 %v67_v46, %v64_v45 }
  0x1a   :  { %913 = vmatpush1.bf16.msra.mxu0 %v912_v14  ;;  %v72_v52 = vld [vmem:[%s1988_s1 + $0x1c0] sm:$0xff]  ;;  %v75_v53 = vld [vmem:[%s1988_s1 + $0x1d8] sm:$0xff]  ;;  %v1052_v56 = vpack.c.bf16 %v21_v49, %v18_v47  ;;  %v926_v57 = vpack.c.bf16 %v74_v51, %v71_v50  ;;  %v70_v58 = vld [vmem:[%s1988_s1 + $0x1b0] sm:$0xff] }
  0x1b   :  { %1041 = vmatpush1.bf16.msra.mxu1 %v1040_v16  ;;  %915 = vmatprep.subr.bf16.mxu0 %v914_v17  ;;  %v73_v59 = vld [vmem:[%s1988_s1 + $0x1c8] sm:$0xff]  ;;  %v24_v60 = vld [vmem:[%s1988_s1 + $0x40] sm:$0xff]  ;;  %v1054_v62 = vpack.c.bf16 %v75_v53, %v72_v52  ;;  %v27_v63 = vld [vmem:[%s1988_s1 + $0x58] sm:$0xff] }
  0x1c   :  { %1043 = vmatprep.subr.bf16.mxu1 %v1042_v21  ;;  %v77_v0 = vld [vmem:[%s1988_s1 + $0x1e8] sm:$0xff]  ;;  %v80_v1 = vld [vmem:[%s1988_s1 + $0x200] sm:$0xff]  ;;  %v78_v2 = vld [vmem:[%s1988_s1 + $0x1f0] sm:$0xff]  ;;  %v928_v4 = vpack.c.bf16 %v73_v59, %v70_v58  ;;  %v1056_v5 = vpack.c.bf16 %v27_v63, %v24_v60 }
  0x1d   :  { %v81_v3 = vld [vmem:[%s1988_s1 + $0x208] sm:$0xff]  ;;  %v930_v6 = vpack.c.bf16 %v80_v1, %v77_v0  ;;  %v76_v8 = vld [vmem:[%s1988_s1 + $0x1e0] sm:$0xff]  ;;  %v79_v9 = vld [vmem:[%s1988_s1 + $0x1f8] sm:$0xff] }
  0x1e   :  { %917 = vmatpush1.bf16.msra.mxu0 %v916_v28  ;;  %v30_v10 = vld [vmem:[%s1988_s1 + $0x70] sm:$0xff]  ;;  %v1058_v12 = vpack.c.bf16 %v81_v3, %v78_v2  ;;  %v33_v13 = vld [vmem:[%s1988_s1 + $0x88] sm:$0xff]  ;;  %v83_v14 = vld [vmem:[%s1988_s1 + $0x218] sm:$0xff]  ;;  %v932_v19 = vpack.c.bf16 %v79_v9, %v76_v8 }
  0x1f   :  { %1045 = vmatpush1.bf16.msra.mxu1 %v1044_v30  ;;  %919 = vmatprep.subr.bf16.mxu0 %v918_v31  ;;  %v86_v16 = vld [vmem:[%s1988_s1 + $0x230] sm:$0xff]  ;;  %v84_v17 = vld [vmem:[%s1988_s1 + $0x220] sm:$0xff]  ;;  %v87_v18 = vld [vmem:[%s1988_s1 + $0x238] sm:$0xff]  ;;  %v1060_v20 = vpack.c.bf16 %v33_v13, %v30_v10 }
  0x20   :  { %1047 = vmatprep.subr.bf16.mxu1 %v1046_v35  ;;  %v934_v21 = vpack.c.bf16 %v86_v16, %v83_v14  ;;  %v82_v22 = vld [vmem:[%s1988_s1 + $0x210] sm:$0xff]  ;;  %v85_v23 = vld [vmem:[%s1988_s1 + $0x228] sm:$0xff]  ;;  %v36_v24 = vld [vmem:[%s1988_s1 + $0xa0] sm:$0xff]  ;;  %v1062_v25 = vpack.c.bf16 %v87_v18, %v84_v17 }
  0x21   :  { %v39_v26 = vld [vmem:[%s1988_s1 + $0xb8] sm:$0xff]  ;;  %v89_v28 = vld [vmem:[%s1988_s1 + $0x248] sm:$0xff]  ;;  %v90_v30 = vld [vmem:[%s1988_s1 + $0x250] sm:$0xff]  ;;  %v936_v32 = vpack.c.bf16 %v85_v23, %v82_v22 }
  0x22   :  { %921 = vmatpush1.bf16.msra.mxu0 %v920_v41  ;;  %v93_v31 = vld [vmem:[%s1988_s1 + $0x268] sm:$0xff]  ;;  %v1064_v33 = vpack.c.bf16 %v39_v26, %v36_v24  ;;  %v88_v35 = vld [vmem:[%s1988_s1 + $0x240] sm:$0xff]  ;;  %v91_v36 = vld [vmem:[%s1988_s1 + $0x258] sm:$0xff] }
  0x23   :  { %1049 = vmatpush1.bf16.msra.mxu1 %v1048_v43  ;;  %923 = vmatprep.subr.bf16.mxu0 %v922_v44  ;;  %v42_v37 = vld [vmem:[%s1988_s1 + $0xd0] sm:$0xff]  ;;  %v1066_v38 = vpack.c.bf16 %v93_v31, %v90_v30  ;;  %v45_v39 = vld [vmem:[%s1988_s1 + $0xe8] sm:$0xff]  ;;  %v95_v40 = vld [vmem:[%s1988_s1 + $0x278] sm:$0xff]  ;;  %v940_v44 = vpack.c.bf16 %v91_v36, %v88_v35 }
  0x24   :  { %1051 = vmatprep.subr.bf16.mxu1 %v1050_v48  ;;  %v98_v41 = vld [vmem:[%s1988_s1 + $0x290] sm:$0xff]  ;;  %v96_v42 = vld [vmem:[%s1988_s1 + $0x280] sm:$0xff]  ;;  %v99_v43 = vld [vmem:[%s1988_s1 + $0x298] sm:$0xff]  ;;  %v1068_v45 = vpack.c.bf16 %v45_v39, %v42_v37 }
  0x25   :  { %v942_v46 = vpack.c.bf16 %v98_v41, %v95_v40  ;;  %v94_v47 = vld [vmem:[%s1988_s1 + $0x270] sm:$0xff]  ;;  %v97_v48 = vld [vmem:[%s1988_s1 + $0x288] sm:$0xff]  ;;  %v48_v49 = vld [vmem:[%s1988_s1 + $0x100] sm:$0xff]  ;;  %v1070_v50 = vpack.c.bf16 %v99_v43, %v96_v42 }
  0x26   :  { %925 = vmatpush1.bf16.msra.mxu0 %v924_v54  ;;  %506 = vmatmul.mubr.f32.vlgmr.msra.gmra.mrb[0].mxu1 %v1444_v55  ;;  %v51_v51 = vld [vmem:[%s1988_s1 + $0x118] sm:$0xff]  ;;  %v101_v52 = vld [vmem:[%s1988_s1 + $0x2a8] sm:$0xff]  ;;  %v104_v53 = vld [vmem:[%s1988_s1 + $0x2c0] sm:$0xff] }
  0x27   :  { %1053 = vmatpush3.bf16.msra.mxu1 %v1052_v56  ;;  %927 = vmatprep.subr.bf16.mxu0 %v926_v57  ;;  %v102_v54 = vld [vmem:[%s1988_s1 + $0x2b0] sm:$0xff]  ;;  %v105_v56 = vld [vmem:[%s1988_s1 + $0x2c8] sm:$0xff]  ;;  %v944_v57 = vpack.c.bf16 %v97_v48, %v94_v47  ;;  %v1072_v58 = vpack.c.bf16 %v51_v51, %v48_v49  ;;  %v946_v59 = vpack.c.bf16 %v104_v53, %v101_v52  ;;  %v100_v60 = vld [vmem:[%s1988_s1 + $0x2a0] sm:$0xff] }
  0x28   :  { %1055 = vmatprep.subr.bf16.mxu1 %v1054_v62  ;;  %576 = vmatprep.mubr.f32.mxu1 %v1391_v29  ;;  %v92_v29 = vld [vmem:[%s1988_s1 + $0x260] sm:$0xff]  ;;  %v103_v62 = vld [vmem:[%s1988_s1 + $0x2b8] sm:$0xff]  ;;  %v54_v63 = vld [vmem:[%s1988_s1 + $0x130] sm:$0xff]  ;;  %v1074_v0 = vpack.c.bf16 %v105_v56, %v102_v54 }
  0x29   :  { %v938_v34 = vpack.c.bf16 %v92_v29, %v89_v28  ;;  %v57_v1 = vld [vmem:[%s1988_s1 + $0x148] sm:$0xff]  ;;  %v107_v2 = vld [vmem:[%s1988_s1 + $0x2d8] sm:$0xff]  ;;  %v110_v3 = vld [vmem:[%s1988_s1 + $0x2f0] sm:$0xff] }
  0x2a   :  { %929 = vmatpush1.bf16.msra.mxu0 %v928_v4  ;;  %v108_v4 = vld [vmem:[%s1988_s1 + $0x2e0] sm:$0xff]  ;;  %v1076_v8 = vpack.c.bf16 %v57_v1, %v54_v63  ;;  %v950_v9 = vpack.c.bf16 %v110_v3, %v107_v2  ;;  %v106_v10 = vld [vmem:[%s1988_s1 + $0x2d0] sm:$0xff]  ;;  %v63_v16 = vld [vmem:[%s1988_s1 + $0x178] sm:$0xff] }
  0x2b   :  { %1057 = vmatpush3.bf16.msra.mxu1 %v1056_v5  ;;  %931 = vmatprep.subr.bf16.mxu0 %v930_v6  ;;  %v111_v5 = vld [vmem:[%s1988_s1 + $0x2f8] sm:$0xff]  ;;  %v948_v6 = vpack.c.bf16 %v103_v62, %v100_v60  ;;  %v60_v13 = vld [vmem:[%s1988_s1 + $0x160] sm:$0xff]  ;;  %v113_v17 = vld [vmem:[%s1988_s1 + $0x308] sm:$0xff] }
  0x2c   :  { %1059 = vmatprep.subr.bf16.mxu1 %v1058_v12  ;;  %v109_v12 = vld [vmem:[%s1988_s1 + $0x2e8] sm:$0xff]  ;;  %v1078_v14 = vpack.c.bf16 %v111_v5, %v108_v4  ;;  %v116_v18 = vld [vmem:[%s1988_s1 + $0x320] sm:$0xff]  ;;  %v1080_v23 = vpack.c.bf16 %v63_v16, %v60_v13  ;;  %v115_v26 = vld [vmem:[%s1988_s1 + $0x318] sm:$0xff] }
  0x2d   :  { %v952_v22 = vpack.c.bf16 %v109_v12, %v106_v10  ;;  %v954_v24 = vpack.c.bf16 %v116_v18, %v113_v17  ;;  %v114_v28 = vld [vmem:[%s1988_s1 + $0x310] sm:$0xff]  ;;  %v117_v30 = vld [vmem:[%s1988_s1 + $0x328] sm:$0xff]  ;;  %v119_v31 = vld [vmem:[%s1988_s1 + $0x338] sm:$0xff] }
  0x2e   :  { %933 = vmatpush1.bf16.msra.mxu0 %v932_v19  ;;  %v162_v19 = vld [vmem:[%s1988_s1 + $0x490] sm:$0xff]  ;;  %v168_v35 = vld [vmem:[%s1988_s1 + $0x4c0] sm:$0xff]  ;;  %v171_v36 = vld [vmem:[%s1988_s1 + $0x4d8] sm:$0xff] }
  0x2f   :  { %1061 = vmatpush3.bf16.msra.mxu1 %v1060_v20  ;;  %935 = vmatprep.subr.bf16.mxu0 %v934_v21  ;;  %v165_v20 = vld [vmem:[%s1988_s1 + $0x4a8] sm:$0xff]  ;;  %v260_v21 = vsub.s32 0, %v1350_v11  ;;  %v118_v40 = vld [vmem:[%s1988_s1 + $0x330] sm:$0xff]  ;;  %v120_v42 = vld [vmem:[%s1988_s1 + $0x340] sm:$0xff]  ;;  %v1086_v43 = vpack.c.bf16 %v171_v36, %v168_v35 }
  0x30   :  { %1063 = vmatprep.subr.bf16.mxu1 %v1062_v25  ;;  %v112_v25 = vld [vmem:[%s1988_s1 + $0x300] sm:$0xff]  ;;  %v1082_v29 = vpack.c.bf16 %v165_v20, %v162_v19  ;;  %v121_v41 = vld [vmem:[%s1988_s1 + $0x348] sm:$0xff]  ;;  %v174_v48 = vld [vmem:[%s1988_s1 + $0x4f0] sm:$0xff] }
  0x31   :  { %v956_v37 = vpack.c.bf16 %v115_v26, %v112_v25  ;;  %v177_v49 = vld [vmem:[%s1988_s1 + $0x508] sm:$0xff]  ;;  %v124_v53 = vld [vmem:[%s1988_s1 + $0x360] sm:$0xff]  ;;  %v127_v54 = vld [vmem:[%s1988_s1 + $0x378] sm:$0xff] }
  0x32   :  { %937 = vmatpush1.bf16.msra.mxu0 %v936_v32  ;;  %v122_v32 = vld [vmem:[%s1988_s1 + $0x350] sm:$0xff]  ;;  %v180_v62 = vld [vmem:[%s1988_s1 + $0x520] sm:$0xff]  ;;  %v183_v63 = vld [vmem:[%s1988_s1 + $0x538] sm:$0xff] }
  0x33   :  { %1065 = vmatpush3.bf16.msra.mxu1 %v1064_v33  ;;  %939 = vmatprep.subr.bf16.mxu0 %v938_v34  ;;  %v272_v33 = vsub.s32 3, %v1350_v11  ;;  %v261_v34 = vrot.slane %v1386_v27, %v260_v21  ;;  %v958_v39 = vpack.c.bf16 %v122_v32, %v119_v31  ;;  %v126_v56 = vld [vmem:[%s1988_s1 + $0x370] sm:$0xff]  ;;  %v133_v4 = vld [vmem:[%s1988_s1 + $0x3a8] sm:$0xff]  ;;  %v132_v5 = vld [vmem:[%s1988_s1 + $0x3a0] sm:$0xff] }
  0x34   :  { %1067 = vmatprep.subr.bf16.mxu1 %v1066_v38  ;;  %v1084_v38 = vpack.c.bf16 %v117_v30, %v114_v28  ;;  %v134_v60 = vld [vmem:[%s1988_s1 + $0x3b0] sm:$0xff]  ;;  %v140_v10 = vld [vmem:[%s1988_s1 + $0x3e0] sm:$0xff]  ;;  %v189_v13 = vld [vmem:[%s1988_s1 + $0x568] sm:$0xff] }
  0x35   :  { %v273_v47 = vrot.slane %v1386_v27, %v272_v33  ;;  %v130_v3 = vld [vmem:[%s1988_s1 + $0x390] sm:$0xff]  ;;  %v136_v18 = vld [vmem:[%s1988_s1 + $0x3c0] sm:$0xff]  ;;  %v139_v19 = vld [vmem:[%s1988_s1 + $0x3d8] sm:$0xff] }
  0x36   :  { %941 = vmatpush1.bf16.msra.mxu0 %v940_v44  ;;  %v123_v44 = vld [vmem:[%s1988_s1 + $0x358] sm:$0xff]  ;;  %v186_v12 = vld [vmem:[%s1988_s1 + $0x550] sm:$0xff]  ;;  %v192_v26 = vld [vmem:[%s1988_s1 + $0x580] sm:$0xff] }
  0x37   :  { %1069 = vmatpush3.bf16.msra.mxu1 %v1068_v45  ;;  %943 = vmatprep.subr.bf16.mxu0 %v942_v46  ;;  %v125_v45 = vld [vmem:[%s1988_s1 + $0x368] sm:$0xff]  ;;  %v128_v46 = vld [vmem:[%s1988_s1 + $0x380] sm:$0xff]  ;;  %v1088_v51 = vpack.c.bf16 %v123_v44, %v120_v42  ;;  %v138_v20 = vld [vmem:[%s1988_s1 + $0x3d0] sm:$0xff] }
  0x38   :  { %1071 = vmatprep.subr.bf16.mxu1 %v1070_v50  ;;  %v960_v50 = vpack.c.bf16 %v121_v41, %v118_v40  ;;  %v962_v52 = vpack.c.bf16 %v128_v46, %v125_v45  ;;  %v146_v25 = vld [vmem:[%s1988_s1 + $0x410] sm:$0xff]  ;;  %v195_v28 = vld [vmem:[%s1988_s1 + $0x598] sm:$0xff] }
  0x3a   :  { %945 = vmatpush1.bf16.msra.mxu0 %v944_v57  ;;  %v1090_v57 = vpack.c.bf16 %v177_v49, %v174_v48 }
  0x3b   :  { %1073 = vmatpush3.bf16.msra.mxu1 %v1072_v58  ;;  %947 = vmatprep.subr.bf16.mxu0 %v946_v59  ;;  %v129_v58 = vld [vmem:[%s1988_s1 + $0x388] sm:$0xff]  ;;  %v131_v59 = vld [vmem:[%s1988_s1 + $0x398] sm:$0xff] }
  0x3c   :  { %1075 = vmatprep.subr.bf16.mxu1 %v1074_v0  ;;  %v964_v0 = vpack.c.bf16 %v127_v54, %v124_v53  ;;  %v1092_v1 = vpack.c.bf16 %v129_v58, %v126_v56  ;;  %v966_v2 = vpack.c.bf16 %v134_v60, %v131_v59 }
  0x3e   :  { %949 = vmatpush1.bf16.msra.mxu0 %v948_v6  ;;  %v1094_v6 = vpack.c.bf16 %v183_v63, %v180_v62 }
  0x3f   :  { %1077 = vmatpush3.bf16.msra.mxu1 %v1076_v8  ;;  %951 = vmatprep.subr.bf16.mxu0 %v950_v9  ;;  %v135_v8 = vld [vmem:[%s1988_s1 + $0x3b8] sm:$0xff]  ;;  %v137_v9 = vld [vmem:[%s1988_s1 + $0x3c8] sm:$0xff] }
  0x40   :  { %1079 = vmatprep.subr.bf16.mxu1 %v1078_v14  ;;  %v968_v14 = vpack.c.bf16 %v133_v4, %v130_v3  ;;  %v1096_v16 = vpack.c.bf16 %v135_v8, %v132_v5  ;;  %v970_v17 = vpack.c.bf16 %v140_v10, %v137_v9 }
  0x42   :  { %953 = vmatpush1.bf16.msra.mxu0 %v952_v22  ;;  %v1098_v22 = vpack.c.bf16 %v189_v13, %v186_v12 }
  0x43   :  { %1081 = vmatpush3.bf16.msra.mxu1 %v1080_v23  ;;  %955 = vmatprep.subr.bf16.mxu0 %v954_v24  ;;  %v141_v23 = vld [vmem:[%s1988_s1 + $0x3e8] sm:$0xff]  ;;  %v143_v24 = vld [vmem:[%s1988_s1 + $0x3f8] sm:$0xff] }
  0x44   :  { %1083 = vmatprep.subr.bf16.mxu1 %v1082_v29  ;;  %v972_v29 = vpack.c.bf16 %v139_v19, %v136_v18 }
  0x45   :  { %364 = vmatmul.mubr.f32.vlgmr.msra.gmra.mrb[0].mxu0 %v261_v34 }
  0x46   :  { %957 = vmatpush1.bf16.msra.mxu0 %v956_v37  ;;  %577 = vmatmul.mubr.f32.vlgmr.msra.gmra.mrb[2].mxu1 %v261_v34 }
  0x47   :  { %1085 = vmatpush3.bf16.msra.mxu1 %v1084_v38  ;;  %959 = vmatprep.subr.bf16.mxu0 %v958_v39 }
  0x48   :  { %1087 = vmatprep.subr.bf16.mxu1 %v1086_v43  ;;  %646 = vmatprep.mubr.f32.mxu1 %v273_v47 }
  0x49   :  { %434 = vmatprep.mubr.f32.mxu0 %v273_v47 }
  0x4a   :  { %961 = vmatpush1.bf16.msra.mxu0 %v960_v50 }
  0x4b   :  { %1089 = vmatpush3.bf16.msra.mxu1 %v1088_v51  ;;  %963 = vmatprep.subr.bf16.mxu0 %v962_v52 }
  0x4c   :  { %1091 = vmatprep.subr.bf16.mxu1 %v1090_v57 }
  0x4e   :  { %965 = vmatpush1.bf16.msra.mxu0 %v964_v0 }
  0x4f   :  { %1093 = vmatpush3.bf16.msra.mxu1 %v1092_v1  ;;  %967 = vmatprep.subr.bf16.mxu0 %v966_v2 }
  0x50   :  { %1095 = vmatprep.subr.bf16.mxu1 %v1094_v6 }
  0x52   :  { %969 = vmatpush1.bf16.msra.mxu0 %v968_v14 }
  0x53   :  { %8 = vsyncpa [#allocation3], 0  ;;  %1097 = vmatpush3.bf16.msra.mxu1 %v1096_v16  ;;  %971 = vmatprep.subr.bf16.mxu0 %v970_v17  ;;  %v1100_v30 = vpack.c.bf16 %v141_v23, %v138_v20  ;;  %v974_v31 = vpack.c.bf16 %v146_v25, %v143_v24  ;;  %v142_v32 = vld [vmem:[%s1988_s1 + $0x3f0] sm:$0xff]  ;;  %v145_v33 = vld [vmem:[%s1988_s1 + $0x408] sm:$0xff]  ;;  %v1102_v35 = vpack.c.bf16 %v195_v28, %v192_v26  ;;  %v268_v2 = vsub.s32 2, %v1350_v11 }
  0x54   :  { %v144_v34 = vld [vmem:[%s1988_s1 + $0x400] sm:$0xff]  ;;  %1099 = vmatprep.subr.bf16.mxu1 %v1098_v22  ;;  %v147_v36 = vld [vmem:[%s1988_s1 + $0x418] sm:$0xff]  ;;  %v149_v37 = vld [vmem:[%s1988_s1 + $0x428] sm:$0xff]  ;;  %v976_v41 = vpack.c.bf16 %v145_v33, %v142_v32  ;;  %v1174_v22 = vmov 0.0|0.0   ;;  %vm1175_vm0 = vmmov 0   ;;  %vm751_vm1 = vcmp.lt.s32.totalorder %v258_v61, 320 }
  0x55   :  { %v152_v38 = vld [vmem:[%s1988_s1 + $0x440] sm:$0xff]  ;;  %v198_v39 = vld [vmem:[%s1988_s1 + $0x5b0] sm:$0xff]  ;;  %v201_v40 = vld [vmem:[%s1988_s1 + $0x5c8] sm:$0xff]  ;;  %v1104_v42 = vpack.c.bf16 %v147_v36, %v144_v34  ;;  %v1830_v13 = vrot.slane %v1386_v27, %v268_v2 }
  0x56   :  { %973 = vmatpush1.bf16.msra.mxu0 %v972_v29  ;;  %v978_v43 = vpack.c.bf16 %v152_v38, %v149_v37  ;;  %v148_v44 = vld [vmem:[%s1988_s1 + $0x420] sm:$0xff]  ;;  %v151_v45 = vld [vmem:[%s1988_s1 + $0x438] sm:$0xff]  ;;  %v150_v46 = vld [vmem:[%s1988_s1 + $0x430] sm:$0xff]  ;;  %v1106_v47 = vpack.c.bf16 %v201_v40, %v198_v39 }
  0x57   :  { %1101 = vmatpush3.bf16.msra.mxu1 %v1100_v30  ;;  %975 = vmatprep.subr.bf16.mxu0 %v974_v31  ;;  %v153_v48 = vld [vmem:[%s1988_s1 + $0x448] sm:$0xff]  ;;  %v155_v49 = vld [vmem:[%s1988_s1 + $0x458] sm:$0xff]  ;;  %v158_v50 = vld [vmem:[%s1988_s1 + $0x470] sm:$0xff]  ;;  %v980_v53 = vpack.c.bf16 %v151_v45, %v148_v44 }
  0x58   :  { %1103 = vmatprep.subr.bf16.mxu1 %v1102_v35  ;;  %v204_v51 = vld [vmem:[%s1988_s1 + $0x5e0] sm:$0xff]  ;;  %v207_v52 = vld [vmem:[%s1988_s1 + $0x5f8] sm:$0xff]  ;;  %v1108_v54 = vpack.c.bf16 %v153_v48, %v150_v46  ;;  %v982_v56 = vpack.c.bf16 %v158_v50, %v155_v49  ;;  %v154_v57 = vld [vmem:[%s1988_s1 + $0x450] sm:$0xff] }
  0x59   :  { %v157_v58 = vld [vmem:[%s1988_s1 + $0x468] sm:$0xff]  ;;  %v156_v59 = vld [vmem:[%s1988_s1 + $0x460] sm:$0xff]  ;;  %v1110_v60 = vpack.c.bf16 %v207_v52, %v204_v51  ;;  %v159_v62 = vld [vmem:[%s1988_s1 + $0x478] sm:$0xff] }
  0x5a   :  { %977 = vmatpush1.bf16.msra.mxu0 %v976_v41  ;;  %v161_v63 = vld [vmem:[%s1988_s1 + $0x488] sm:$0xff]  ;;  %v164_v0 = vld [vmem:[%s1988_s1 + $0x4a0] sm:$0xff]  ;;  %v984_v1 = vpack.c.bf16 %v157_v58, %v154_v57  ;;  %v1112_v3 = vpack.c.bf16 %v159_v62, %v156_v59  ;;  %v163_v6 = vld [vmem:[%s1988_s1 + $0x498] sm:$0xff] }
  0x5b   :  { %1105 = vmatpush3.bf16.msra.mxu1 %v1104_v42  ;;  %979 = vmatprep.subr.bf16.mxu0 %v978_v43  ;;  %v986_v4 = vpack.c.bf16 %v164_v0, %v161_v63  ;;  %v160_v5 = vld [vmem:[%s1988_s1 + $0x480] sm:$0xff]  ;;  %v210_v8 = vld [vmem:[%s1988_s1 + $0x610] sm:$0xff]  ;;  %v213_v9 = vld [vmem:[%s1988_s1 + $0x628] sm:$0xff] }
  0x5c   :  { %1107 = vmatprep.subr.bf16.mxu1 %v1106_v47  ;;  %v167_v10 = vld [vmem:[%s1988_s1 + $0x4b8] sm:$0xff]  ;;  %v170_v12 = vld [vmem:[%s1988_s1 + $0x4d0] sm:$0xff]  ;;  %v988_v14 = vpack.c.bf16 %v163_v6, %v160_v5  ;;  %v1115_v16 = vpack.c.bf16 %v213_v9, %v210_v8  ;;  %v169_v19 = vld [vmem:[%s1988_s1 + $0x4c8] sm:$0xff] }
  0x5d   :  { %v990_v17 = vpack.c.bf16 %v170_v12, %v167_v10  ;;  %v166_v18 = vld [vmem:[%s1988_s1 + $0x4b0] sm:$0xff]  ;;  %v216_v20 = vld [vmem:[%s1988_s1 + $0x640] sm:$0xff]  ;;  %v219_v27 = vld [vmem:[%s1988_s1 + $0x658] sm:$0xff] }
  0x5e   :  { %981 = vmatpush1.bf16.msra.mxu0 %v980_v53  ;;  %v173_v23 = vld [vmem:[%s1988_s1 + $0x4e8] sm:$0xff]  ;;  %v176_v24 = vld [vmem:[%s1988_s1 + $0x500] sm:$0xff]  ;;  %v992_v25 = vpack.c.bf16 %v169_v19, %v166_v18  ;;  %v1118_v26 = vpack.c.bf16 %v219_v27, %v216_v20  ;;  %v175_v30 = vld [vmem:[%s1988_s1 + $0x4f8] sm:$0xff] }
  0x5f   :  { %1109 = vmatpush3.bf16.msra.mxu1 %v1108_v54  ;;  %983 = vmatprep.subr.bf16.mxu0 %v982_v56  ;;  %v994_v28 = vpack.c.bf16 %v176_v24, %v173_v23  ;;  %v172_v29 = vld [vmem:[%s1988_s1 + $0x4e0] sm:$0xff]  ;;  %v222_v31 = vld [vmem:[%s1988_s1 + $0x670] sm:$0xff]  ;;  %v225_v32 = vld [vmem:[%s1988_s1 + $0x688] sm:$0xff] }
  0x60   :  { %1111 = vmatprep.subr.bf16.mxu1 %v1110_v60  ;;  %v179_v33 = vld [vmem:[%s1988_s1 + $0x518] sm:$0xff]  ;;  %v182_v34 = vld [vmem:[%s1988_s1 + $0x530] sm:$0xff]  ;;  %v996_v35 = vpack.c.bf16 %v175_v30, %v172_v29  ;;  %v1121_v36 = vpack.c.bf16 %v225_v32, %v222_v31  ;;  %v181_v39 = vld [vmem:[%s1988_s1 + $0x528] sm:$0xff] }
  0x61   :  { %v998_v37 = vpack.c.bf16 %v182_v34, %v179_v33  ;;  %v178_v38 = vld [vmem:[%s1988_s1 + $0x510] sm:$0xff]  ;;  %v228_v40 = vld [vmem:[%s1988_s1 + $0x6a0] sm:$0xff]  ;;  %v185_v41 = vld [vmem:[%s1988_s1 + $0x548] sm:$0xff] }
  0x62   :  { %985 = vmatpush1.bf16.msra.mxu0 %v984_v1  ;;  %v188_v42 = vld [vmem:[%s1988_s1 + $0x560] sm:$0xff]  ;;  %v1000_v43 = vpack.c.bf16 %v181_v39, %v178_v38  ;;  %v187_v47 = vld [vmem:[%s1988_s1 + $0x558] sm:$0xff]  ;;  %v234_v48 = vld [vmem:[%s1988_s1 + $0x6d0] sm:$0xff] }
  0x63   :  { %1113 = vmatpush3.bf16.msra.mxu1 %v1112_v3  ;;  %987 = vmatprep.subr.bf16.mxu0 %v986_v4  ;;  %v1002_v45 = vpack.c.bf16 %v188_v42, %v185_v41  ;;  %v184_v46 = vld [vmem:[%s1988_s1 + $0x540] sm:$0xff]  ;;  %v237_v49 = vld [vmem:[%s1988_s1 + $0x6e8] sm:$0xff]  ;;  %v191_v50 = vld [vmem:[%s1988_s1 + $0x578] sm:$0xff] }
  0x64   :  { %1114 = vmatprep.subr.bf16.mxu1 %v1174_v22  ;;  %v194_v51 = vld [vmem:[%s1988_s1 + $0x590] sm:$0xff]  ;;  %v1004_v52 = vpack.c.bf16 %v187_v47, %v184_v46  ;;  %v1127_v53 = vpack.c.bf16 %v237_v49, %v234_v48  ;;  %v193_v57 = vld [vmem:[%s1988_s1 + $0x588] sm:$0xff]  ;;  %v240_v58 = vld [vmem:[%s1988_s1 + $0x700] sm:$0xff] }
  0x65   :  { %v1006_v54 = vpack.c.bf16 %v194_v51, %v191_v50  ;;  %v190_v56 = vld [vmem:[%s1988_s1 + $0x570] sm:$0xff]  ;;  %v243_v59 = vld [vmem:[%s1988_s1 + $0x718] sm:$0xff]  ;;  %v197_v60 = vld [vmem:[%s1988_s1 + $0x5a8] sm:$0xff] }
  0x66   :  { %647 = vmatmul.mubr.f32.vlgmr.msra.gmra.mrb[4].mxu1 %v1830_v13  ;;  %989 = vmatpush1.bf16.msra.mxu0 %v988_v14  ;;  %v200_v62 = vld [vmem:[%s1988_s1 + $0x5c0] sm:$0xff]  ;;  %v1008_v63 = vpack.c.bf16 %v193_v57, %v190_v56  ;;  %v1130_v0 = vpack.c.bf16 %v243_v59, %v240_v58  ;;  %v199_v4 = vld [vmem:[%s1988_s1 + $0x5b8] sm:$0xff]  ;;  %v246_v5 = vld [vmem:[%s1988_s1 + $0x730] sm:$0xff] }
  0x67   :  { %1116 = vmatpush3.bf16.msra.mxu1 %v1115_v16  ;;  %991 = vmatprep.subr.bf16.mxu0 %v990_v17  ;;  %v1010_v1 = vpack.c.bf16 %v200_v62, %v197_v60  ;;  %v196_v3 = vld [vmem:[%s1988_s1 + $0x5a0] sm:$0xff]  ;;  %v249_v6 = vld [vmem:[%s1988_s1 + $0x748] sm:$0xff]  ;;  %v203_v8 = vld [vmem:[%s1988_s1 + $0x5d8] sm:$0xff] }
  0x68   :  { %1117 = vmatprep.subr.bf16.mxu1 %v1174_v22  ;;  %887 = vmatprep.mubr.msk.f32.mxu1 %vm1175_vm0, %v1173_v7  ;;  %v231_v7 = vld [vmem:[%s1988_s1 + $0x6b8] sm:$0xff]  ;;  %v206_v9 = vld [vmem:[%s1988_s1 + $0x5f0] sm:$0xff]  ;;  %v1012_v10 = vpack.c.bf16 %v199_v4, %v196_v3  ;;  %v1133_v12 = vpack.c.bf16 %v249_v6, %v246_v5  ;;  %v205_v17 = vld [vmem:[%s1988_s1 + $0x5e8] sm:$0xff] }
  0x69   :  { %v1124_v44 = vpack.c.bf16 %v231_v7, %v228_v40  ;;  %v1014_v14 = vpack.c.bf16 %v206_v9, %v203_v8  ;;  %v202_v16 = vld [vmem:[%s1988_s1 + $0x5d0] sm:$0xff]  ;;  %v252_v18 = vld [vmem:[%s1988_s1 + $0x760] sm:$0xff]  ;;  %v255_v19 = vld [vmem:[%s1988_s1 + $0x778] sm:$0xff] }
  0x6a   :  { %993 = vmatpush1.bf16.msra.mxu0 %v992_v25  ;;  %v1016_v20 = vpack.c.bf16 %v205_v17, %v202_v16  ;;  %v1136_v27 = vpack.c.bf16 %v255_v19, %v252_v18  ;;  %v256_v29 = vld [vmem:[%s1989_s2] sm:$0x7]  ;;  %s1177_s2 = smov [#allocation2]  }
  0x6b   :  { %1119 = vmatpush3.bf16.msra.mxu1 %v1118_v26  ;;  %995 = vmatprep.subr.bf16.mxu0 %v994_v28  ;;  %v295_v30 = vrot.slane %v256_v29, %v268_v2  ;;  %s760_s23 = sshll.u32 %s1177_s2, 4  ;;  %s761_s23 = int_to_ptr.vmem [resolvable:$true] %s760_s23 }
  0x6c   :  { %1120 = vmatprep.subr.bf16.mxu1 %v1174_v22  ;;  %s1149_s24 = scalar_lea.vmem %s761_s23, 48  ;;  %s1153_s25 = scalar_lea.vmem %s761_s23, 64 }
  0x6d   :  { %p1150_p0 = scmp.ne.s32.totalorder %s761_s23, %s1149_s24  ;;  %p1154_p1 = scmp.lt.s32.totalorder %s761_s23, %s761_s23 }
  0x6e   :  { %997 = vmatpush1.bf16.msra.mxu0 %v996_v35  ;;  %p1155_p2 = scmp.lt.s32.totalorder %s1153_s25, %s1149_s24 }
  0x6f   :  { %1122 = vmatpush3.bf16.msra.mxu1 %v1121_v36  ;;  %999 = vmatprep.subr.bf16.mxu0 %v998_v37  ;;  %v291_v36 = vrot.slane %v256_v29, %v264_v15 }
  0x70   :  { %1123 = vmatprep.subr.bf16.mxu1 %v1174_v22  ;;  %p1156_p3 = por %p1155_p2, %p1154_p1 }
  0x72   :  { %1001 = vmatpush1.bf16.msra.mxu0 %v1000_v43  ;;  %p1157_p4 = pnand %p1156_p3, %p1150_p0 }
  0x73   :  { %1125 = vmatpush3.bf16.msra.mxu1 %v1124_v44  ;;  %1003 = vmatprep.subr.bf16.mxu0 %v1002_v45 }
  0x74   :  { %1126 = vmatprep.subr.bf16.mxu1 %v1174_v22 }
  0x76   :  { %1005 = vmatpush1.bf16.msra.mxu0 %v1004_v52 }
  0x77   :  { %1128 = vmatpush3.bf16.msra.mxu1 %v1127_v53  ;;  %1007 = vmatprep.subr.bf16.mxu0 %v1006_v54 }
  0x78   :  { %1129 = vmatprep.subr.bf16.mxu1 %v1174_v22 }
  0x7a   :  { %1009 = vmatpush1.bf16.msra.mxu0 %v1008_v63 }
  0x7b   :  { %1131 = vmatpush3.bf16.msra.mxu1 %v1130_v0  ;;  %1011 = vmatprep.subr.bf16.mxu0 %v1010_v1 }
  0x7c   :  { %1132 = vmatprep.subr.bf16.mxu1 %v1174_v22 }
  0x7e   :  { %1013 = vmatpush1.bf16.msra.mxu0 %v1012_v10 }
  0x7f   :  { %1134 = vmatpush3.bf16.msra.mxu1 %v1133_v12  ;;  %1015 = vmatprep.subr.bf16.mxu0 %v1014_v14 }
  0x80   :  { %1135 = vmatprep.subr.bf16.mxu1 %v1174_v22 }
  0x82   :  { %1017 = vmatpush1.bf16.msra.mxu0 %v1016_v20 }
  0x83   :  { %1137 = vmatpush3.bf16.msra.mxu1 %v1136_v27 }
  0x85   :  { %435 = vmatmul.mubr.f32.vlgmr.msra.gmra.mrb[0].mxu0 %v1830_v13  ;;  %v1176_v13 = vmov 1966171168  }
  0x86   :  { %888 = vmatmul.mubr.f32.vlgmr.msra.gmra.mrb[6].mxu1 %v1444_v55  ;;  %v727_v35 = vunpack.c.l.s4 %v1176_v13  ;;  %v287_v55 = vrot.slane %v256_v29, %v260_v21 }
  0x88   :  { %v728_v38 = vunpack.c.0.s8 %v727_v35 }
  0x8a   :  { %v731_v44 = vsub.s32 %v728_v38, %v1350_v11 }
  0xf9   :  { %v507_v23 = vpop.f32.mrb[0].mxu1 }
  0xfa   :  { %v509_v24 = vpop.f32.mrb[1].mxu1 }
 0x119   :  { %v800_v25 = vpop.f32.mrb[2].mxu1 }
 0x11a   :  { %v801_v26 = vpop.f32.mrb[3].mxu1 }
 0x11b   :  { %v802_v28 = vadd.f32 %v801_v26, %v800_v25 }
 0x11d   :  { %v579_v32 = vadd.f32 %v802_v28, %v295_v30 }
 0x139   :  { %v835_v31 = vpop.f32.mrb[4].mxu1 }
 0x13a   :  { %v836_v22 = vpop.f32.mrb[5].mxu1 }
 0x13b   :  { %v837_v33 = vadd.f32 %v836_v22, %v835_v31 }
 0x13d   :  { %v649_v34 = vadd.f32 %v837_v33, %v579_v32 }
 0x158   :  { %v436_v37 = vpop.f32.mrb[0].mxu0 }
 0x159   :  { %v1138_v39 = vadd.f32 %v436_v37, %v287_v55  ;;  %v718_v40 = vpop.f32.mrb[6].mxu1  ;;  %v438_v7 = vpop.f32.mrb[1].mxu0 }
 0x15a   :  { %v719_v41 = vadd.f32 %v718_v40, %v649_v34  ;;  %v1140_v2 = vadd.f32 %v438_v7, %v291_v36  ;;  %v889_v42 = vpop.f32.mrb[7].mxu1 }
 0x15b   :  { %v1139_v43 = vadd.f32 %v1138_v39, %v507_v23 }
 0x15c   :  { %v1141_v45 = vadd.f32 %v1140_v2, %v509_v24  ;;  %v739_v47 = vrot.slane %v719_v41, %v731_v44 }
 0x15e   :  { %v725_v46 = vcombine.low %v1139_v43, %v1141_v45 }
 0x160   :  { %v732_v48 = vrot.slane %v725_v46, %v731_v44 }
 0x162   :  { %v740_v21 = vcombine.low %v732_v48, %v739_v47 }
 0x164   :  { %v747_v15 = vrot.slane %v740_v21, %v731_v44 }
 0x166   :  { %753 = vst.msk [vmem:[#allocation2] sm:$0x7] %vm751_vm1, %v747_v15 }
 0x167   :  { %1160 = shalt.err (!%p1157_p4)
}
 0x168   :  { %s1161_s28 = scalar_lea.hbm %s1990_s3, 48 }
 0x169   :  { %p1162_p5 = scmp.ne.s32.totalorder %s1990_s3, %s1161_s28  ;;  %p1165_p6 = scmp.lt.u32.totalorder %s1161_s28, %s1990_s3 }
 0x16b   :  { %p1167_p7 = pnand %p1165_p6, %p1162_p5 }
 0x16d   :  { %1170 = shalt.err (!%p1167_p7)
}
 0x16e   :  { %763 = dma.vmem_to_hbm [thread:$0]  %s761_s23, 48, %s1990_s3, [#allocation3]  }
 0x16f   :  { %1171 = dma.done.wait [#allocation3], 48  }
 0x170   :  { %1172 = vsyncadd [#allocation3], 4294967248 }
 0x171   :  { %767 = vsyncpa [#allocation3], 1 }

</bundles_post_ra>
